<compile_context>
chip_gen: v7x
topology: tpu7x:2x2x1
jax: 0.10.0
libtpu: 0.0.40
codegen_flags: <defaults>
</compile_context>

<pallas_src>
import jax
import jax.numpy as jnp
from jax.experimental import pallas as pl
from jax.experimental.pallas import tpu as pltpu


def _multibox_loss_kernel(cls_ref, reg_ref, tgt_ref, out_ref):
    # Inputs arrive in their natural anchor-major layouts (no wrapper pack):
    #   cls_ref: (N, 2)  class logits
    #   reg_ref: (N, 4)  regression predictions
    #   tgt_ref: (N, 5)  col 0 = label in {-1, 0, 1}, cols 1:5 = box targets
    cls_pred = cls_ref[...].astype(jnp.float32)   # free if already f32
    reg_pred = reg_ref[...].astype(jnp.float32)
    tgt = tgt_ref[...].astype(jnp.float32)

    label = tgt[:, 0:1]          # (N, 1)
    reg_tgt = tgt[:, 1:5]        # (N, 4)

    pos = label > 0.5            # label == 1  (robust compare)
    sel = label > -0.5           # label in {0, 1}

    # ---- classification: 2-class CE via stable softplus of the margin ------
    #   CE(logits, y) = logsumexp(l0, l1) - l_y = softplus(l_other - l_y)
    l0 = cls_pred[:, 0:1]        # (N, 1)
    l1 = cls_pred[:, 1:2]        # (N, 1)
    d = l0 - l1
    margin = jnp.where(pos, d, -d)                                   # (N, 1)
    ce = jnp.maximum(margin, 0.0) + jnp.log(1.0 + jnp.exp(-jnp.abs(margin)))
    closs = jnp.sum(jnp.where(sel, ce, 0.0)) * (1.0 / 64.0)

    # ---- regression: smooth L1 (beta = 1), pos-masked sum, one scale -------
    diff = reg_pred - reg_tgt
    ad = jnp.abs(diff)
    sl1 = jnp.where(ad < 1.0, 0.5 * diff * diff, ad - 0.5)           # (N, 4)
    rloss = jnp.sum(jnp.where(pos, sl1, 0.0)) * (1.0 / (4.0 * 16.0))

    out_ref[0] = closs
    out_ref[1] = rloss
    out_ref[2] = closs + rloss


def multibox_loss(class_pred, reg_pred, targets):
    """Pallas implementation of MultiBoxLoss.forward.

    Args:
      class_pred: (N, 2) logits          (cout)
      reg_pred:   (N, 4)                  (rout)
      targets:    (N, 5) — col 0 = label in {-1, 0, 1}, cols 1:5 = box targets

    Returns (closs, rloss, loss, reg_pred, reg_target, pos_mask, neg_mask).
    """
    # TODO(synk): PyTorch returns dynamic-length index lists (pos_index /
    # neg_index); JAX needs static shapes, so boolean masks are returned.
    out = pl.pallas_call(
        _multibox_loss_kernel,
        out_shape=jax.ShapeDtypeStruct((3,), jnp.float32),
        in_specs=[pl.BlockSpec(memory_space=pltpu.MemorySpace.VMEM)] * 3,
        out_specs=pl.BlockSpec(memory_space=pltpu.MemorySpace.SMEM),
    )(class_pred, reg_pred, targets)

    closs = out[0]
    rloss = out[1]
    loss = out[2]
    reg_target = targets[:, 1:]
    label = targets[:, 0]
    pos_mask = label > 0.5
    neg_mask = jnp.logical_and(label > -0.5, label < 0.5)
    return closs, rloss, loss, reg_pred, reg_target, pos_mask, neg_mask


def _reference(class_pred, reg_pred, targets):
    """Pure-JAX reference of the same math (for validation)."""
    cls_t = targets[:, 0]
    pos = cls_t == 1.0
    neg = cls_t == 0.0
    sel = jnp.logical_or(pos, neg)
    lse = jax.scipy.special.logsumexp(class_pred, axis=1)
    picked = jnp.where(pos, class_pred[:, 1], class_pred[:, 0])
    ce = lse - picked
    closs = jnp.sum(jnp.where(sel, ce, 0.0)) / 64.0
    diff = reg_pred - targets[:, 1:]
    ad = jnp.abs(diff)
    sl1 = jnp.where(ad < 1.0, 0.5 * diff * diff, ad - 0.5)
    row = jnp.sum(sl1, axis=1) / 4.0
    rloss = jnp.sum(jnp.where(pos, row, 0.0)) / 16.0
    return closs, rloss, closs + rloss


if __name__ == "__main__":
    key = jax.random.PRNGKey(0)
    k1, k2, k3, k4 = jax.random.split(key, 4)

    N = 64  # number of selected anchors (consistent with /64 and /16 normalizers)
    class_pred = jax.random.normal(k1, (N, 2), dtype=jnp.float32)     # cout
    reg_pred = jax.random.normal(k2, (N, 4), dtype=jnp.float32)       # rout
    labels = jax.random.randint(k3, (N,), -1, 2).astype(jnp.float32)  # {-1,0,1}
    reg_tgt = jax.random.normal(k4, (N, 4), dtype=jnp.float32)
    targets = jnp.concatenate([labels[:, None], reg_tgt], axis=1)     # (N, 5)

    closs, rloss, loss, rp, rt, pos_mask, neg_mask = multibox_loss(
        class_pred, reg_pred, targets)
    jax.block_until_ready((closs, rloss, loss, rp, rt, pos_mask, neg_mask))

    # sanity check against pure-JAX reference
    closs_r, rloss_r, loss_r = _reference(class_pred, reg_pred, targets)
    assert jnp.allclose(closs, closs_r, atol=1e-5, rtol=1e-5), (closs, closs_r)
    assert jnp.allclose(rloss, rloss_r, atol=1e-5, rtol=1e-5), (rloss, rloss_r)
    assert jnp.allclose(loss, loss_r, atol=1e-5, rtol=1e-5), (loss, loss_r)
    assert bool(jnp.all(pos_mask == (labels == 1.0)))
    assert bool(jnp.all(neg_mask == (labels == 0.0)))

    print("KERNEL_OK")
</pallas_src>

<mosaic_0001>
module attributes {stable_mosaic.version = 11 : i64} {
  func.func @_multibox_loss_kernel(%arg0: memref<64x2xf32, #tpu.memory_space<vmem>>, %arg1: memref<64x4xf32, #tpu.memory_space<vmem>>, %arg2: memref<64x5xf32, #tpu.memory_space<vmem>>, %arg3: memref<3xf32, #tpu.memory_space<smem>>) attributes {dimension_semantics = [], scalar_prefetch = 0 : i64, scratch_operands = 0 : i64, tpu.core_type = #tpu.core_type<tc>} {
    %c0 = arith.constant 0 : index
    %c0_0 = arith.constant 0 : index
    %0 = vector.load %arg0[%c0, %c0_0] : memref<64x2xf32, #tpu.memory_space<vmem>>, vector<64x2xf32>
    %c0_1 = arith.constant 0 : index
    %c0_2 = arith.constant 0 : index
    %1 = vector.load %arg1[%c0_1, %c0_2] : memref<64x4xf32, #tpu.memory_space<vmem>>, vector<64x4xf32>
    %c0_3 = arith.constant 0 : index
    %c0_4 = arith.constant 0 : index
    %2 = vector.load %arg2[%c0_3, %c0_4] : memref<64x5xf32, #tpu.memory_space<vmem>>, vector<64x5xf32>
    %3 = vector.extract_strided_slice %2 {offsets = [0, 0], sizes = [64, 1], strides = [1, 1]} : vector<64x5xf32> to vector<64x1xf32>
    %4 = vector.extract_strided_slice %2 {offsets = [0, 1], sizes = [64, 4], strides = [1, 1]} : vector<64x5xf32> to vector<64x4xf32>
    %cst = arith.constant 5.000000e-01 : f32
    %5 = vector.broadcast %cst : f32 to vector<64x1xf32>
    %6 = arith.cmpf ogt, %3, %5 : vector<64x1xf32>
    %cst_5 = arith.constant -5.000000e-01 : f32
    %7 = vector.broadcast %cst_5 : f32 to vector<64x1xf32>
    %8 = arith.cmpf ogt, %3, %7 : vector<64x1xf32>
    %9 = vector.extract_strided_slice %0 {offsets = [0, 0], sizes = [64, 1], strides = [1, 1]} : vector<64x2xf32> to vector<64x1xf32>
    %10 = vector.extract_strided_slice %0 {offsets = [0, 1], sizes = [64, 1], strides = [1, 1]} : vector<64x2xf32> to vector<64x1xf32>
    %11 = arith.subf %9, %10 : vector<64x1xf32>
    %cst_6 = arith.constant 0.000000e+00 : f32
    %12 = vector.broadcast %cst_6 : f32 to vector<64x1xf32>
    %13 = arith.subf %12, %11 : vector<64x1xf32>
    %14 = arith.select %6, %11, %13 : vector<64x1xi1>, vector<64x1xf32>
    %cst_7 = arith.constant 0.000000e+00 : f32
    %15 = vector.broadcast %cst_7 : f32 to vector<64x1xf32>
    %16 = arith.maximumf %14, %15 : vector<64x1xf32>
    %17 = math.absf %14 : vector<64x1xf32>
    %cst_8 = arith.constant 0.000000e+00 : f32
    %18 = vector.broadcast %cst_8 : f32 to vector<64x1xf32>
    %19 = arith.subf %18, %17 : vector<64x1xf32>
    %20 = math.exp %19 : vector<64x1xf32>
    %cst_9 = arith.constant 1.000000e+00 : f32
    %21 = vector.broadcast %cst_9 : f32 to vector<64x1xf32>
    %22 = arith.addf %21, %20 : vector<64x1xf32>
    %23 = math.log %22 : vector<64x1xf32>
    %24 = arith.addf %16, %23 : vector<64x1xf32>
    %cst_10 = arith.constant 0.000000e+00 : f32
    %25 = vector.broadcast %cst_10 : f32 to vector<64x1xf32>
    %26 = arith.select %8, %24, %25 : vector<64x1xi1>, vector<64x1xf32>
    %27 = vector.shape_cast %26 : vector<64x1xf32> to vector<1x64x1xf32>
    %cst_11 = arith.constant dense<0.000000e+00> : vector<1xf32>
    %28 = vector.multi_reduction <add>, %27, %cst_11 [1, 2] : vector<1x64x1xf32> to vector<1xf32>
    %29 = vector.shape_cast %28 : vector<1xf32> to vector<1x1x1xf32>
    %30 = vector.extract %29[0, 0, 0] : f32 from vector<1x1x1xf32>
    %cst_12 = arith.constant 1.562500e-02 : f32
    %31 = arith.mulf %30, %cst_12 : f32
    %32 = arith.subf %1, %4 : vector<64x4xf32>
    %33 = math.absf %32 : vector<64x4xf32>
    %cst_13 = arith.constant 1.000000e+00 : f32
    %34 = vector.broadcast %cst_13 : f32 to vector<64x4xf32>
    %35 = arith.cmpf olt, %33, %34 : vector<64x4xf32>
    %cst_14 = arith.constant 5.000000e-01 : f32
    %36 = vector.broadcast %cst_14 : f32 to vector<64x4xf32>
    %37 = arith.mulf %36, %32 : vector<64x4xf32>
    %38 = arith.mulf %37, %32 : vector<64x4xf32>
    %cst_15 = arith.constant 5.000000e-01 : f32
    %39 = vector.broadcast %cst_15 : f32 to vector<64x4xf32>
    %40 = arith.subf %33, %39 : vector<64x4xf32>
    %41 = arith.select %35, %38, %40 : vector<64x4xi1>, vector<64x4xf32>
    %cst_16 = arith.constant 0.000000e+00 : f32
    %42 = vector.shape_cast %6 : vector<64x1xi1> to vector<64x1xi1>
    %43 = vector.broadcast %42 : vector<64x1xi1> to vector<64x4xi1>
    %44 = vector.broadcast %cst_16 : f32 to vector<64x4xf32>
    %45 = arith.select %43, %41, %44 : vector<64x4xi1>, vector<64x4xf32>
    %46 = vector.shape_cast %45 : vector<64x4xf32> to vector<1x64x4xf32>
    %cst_17 = arith.constant dense<0.000000e+00> : vector<1xf32>
    %47 = vector.multi_reduction <add>, %46, %cst_17 [1, 2] : vector<1x64x4xf32> to vector<1xf32>
    %48 = vector.shape_cast %47 : vector<1xf32> to vector<1x1x1xf32>
    %49 = vector.extract %48[0, 0, 0] : f32 from vector<1x1x1xf32>
    %cst_18 = arith.constant 1.562500e-02 : f32
    %50 = arith.mulf %49, %cst_18 : f32
    %c0_19 = arith.constant 0 : index
    %51 = memref.load %arg3[%c0_19] : memref<3xf32, #tpu.memory_space<smem>>
    memref.store %31, %arg3[%c0_19] : memref<3xf32, #tpu.memory_space<smem>>
    %c1 = arith.constant 1 : index
    %52 = memref.load %arg3[%c1] : memref<3xf32, #tpu.memory_space<smem>>
    memref.store %50, %arg3[%c1] : memref<3xf32, #tpu.memory_space<smem>>
    %53 = arith.addf %31, %50 : f32
    %c2 = arith.constant 2 : index
    %54 = memref.load %arg3[%c2] : memref<3xf32, #tpu.memory_space<smem>>
    memref.store %53, %arg3[%c2] : memref<3xf32, #tpu.memory_space<smem>>
    return
  }
}

</mosaic_0001>

<bundles_post_ra>
// kernel: tpu_custom_call.1
= control target key start
LH: loop header
LB: loop body
LE: loop exit
PB: predicated region body
PF: predicated region fallthrough
CT: control target
= control target key end

     0   :  { %s460_s16 = smov 127   ;;  %v461_v4 = vmov 0   ;;  %s833_s0 = inlined_call_operand.vmem [shape: f32[64,2], index: 0, kind: input, shape index: {}]   ;;  %s834_s1 = inlined_call_operand.vmem [shape: f32[64,4], index: 1, kind: input, shape index: {}]   ;;  %s835_s2 = inlined_call_operand.vmem [shape: f32[64,5], index: 2, kind: input, shape index: {}]   ;;  %s836_s3 = inlined_call_operand.hbm [shape: f32[3], index: 3, kind: output, shape index: {}]  }
   0x1   :  { %v486_v0 = vld [vmem:[%s833_s0 + $0x10] sm:$0xff]  ;;  %v491_v1 = vld [vmem:[%s833_s0] sm:$0xff]  ;;  %v500_v2 = vld [vmem:[%s833_s0 + $0x18] sm:$0xff]  ;;  %415 = vset.pattern.permute.xlu1 %v461_v4  ;;  %414 = vset.pattern.permute.xlu0 %v461_v4 }
   0x2   :  { %67 = vrot.lane.b32.xlu1 %v486_v0, %s460_s16  ;;  %63 = vrot.lane.b32.xlu0 %v491_v1, %s460_s16  ;;  %v505_v3 = vld [vmem:[%s833_s0 + $0x8] sm:$0xff]  ;;  %v519_v6 = vld [vmem:[%s833_s0 + $0x20] sm:$0xff] }
   0x3   :  { %v514_v5 = vld [vmem:[%s833_s0 + $0x28] sm:$0xff] }
   0x6   :  { %69 = vrot.lane.b32.xlu1 %v500_v2, %s460_s16  ;;  %65 = vrot.lane.b32.xlu0 %v505_v3, %s460_s16 }
   0x7   :  { %8 = vsyncpa [#allocation3], 0  ;;  %v524_v7 = vld [vmem:[%s835_s2 + $0x8] sm:$0xff]  ;;  %v529_v8 = vld [vmem:[%s835_s2] sm:$0xff]  ;;  %vm353_vm10 = vcmask 31744   ;;  %vm191_vm12 = vcmask 7168  }
   0x8   :  { %v538_v9 = vld [vmem:[%s833_s0 + $0x38] sm:$0xff]  ;;  %v543_v10 = vld [vmem:[%s833_s0 + $0x30] sm:$0xff]  ;;  %vm40_vm0 = vcmp.gt.f32.partialorder %v524_v7, 0.5  ;;  %vm39_vm1 = vcmp.gt.f32.partialorder %v529_v8, 0.5  ;;  %v576_v16 = vld [vmem:[%s835_s2 + $0x20] sm:$0xff]  ;;  %vm47_vm8 = vcmp.gt.f32.partialorder %v529_v8, -0.5 }
   0x9   :  { %v306_v11 = vsel %vm40_vm0, 1, %v461_v4  ;;  %v305_v12 = vsel %vm39_vm1, 1, %v461_v4  ;;  %v558_v13 = vld [vmem:[%s835_s2 + $0x10] sm:$0xff]  ;;  %v564_v14 = vld [vmem:[%s835_s2 + $0x18] sm:$0xff]  ;;  %vm43_vm4 = vcmp.gt.f32.partialorder %v576_v16, 0.5  ;;  %v586_v18 = vld [vmem:[%s835_s2 + $0x28] sm:$0xff] }
   0xa   :  { %73 = vrot.lane.b32.xlu1 %v514_v5, %s460_s16  ;;  %71 = vrot.lane.b32.xlu0 %v519_v6, %s460_s16  ;;  %vm41_vm2 = vcmp.gt.f32.partialorder %v558_v13, 0.5  ;;  %vm42_vm3 = vcmp.gt.f32.partialorder %v564_v14, 0.5  ;;  %v309_v19 = vsel %vm43_vm4, 1, %v461_v4  ;;  %vm44_vm5 = vcmp.gt.f32.partialorder %v586_v18, 0.5  ;;  %v596_v20 = vld [vmem:[%s835_s2 + $0x30] sm:$0xff]  ;;  %v606_v22 = vld [vmem:[%s835_s2 + $0x38] sm:$0xff] }
   0xb   :  { %v307_v15 = vsel %vm41_vm2, 1, %v461_v4  ;;  %v308_v17 = vsel %vm42_vm3, 1, %v461_v4  ;;  %v310_v21 = vsel %vm44_vm5, 1, %v461_v4  ;;  %vm45_vm6 = vcmp.gt.f32.partialorder %v596_v20, 0.5  ;;  %s448_s10 = scalar_lea.hbm %s836_s3, 16 }
   0xc   :  { %v311_v23 = vsel %vm45_vm6, 1, %v461_v4  ;;  %vm46_vm7 = vcmp.gt.f32.partialorder %v606_v22, 0.5  ;;  %vm49_vm9 = vcmp.gt.f32.partialorder %v558_v13, -0.5  ;;  %vm48_vm11 = vcmp.gt.f32.partialorder %v524_v7, -0.5  ;;  %p449_p0 = scmp.ne.s32.totalorder %s836_s3, %s448_s10  ;;  %p452_p1 = scmp.lt.u32.totalorder %s448_s10, %s836_s3 }
   0xd   :  { %v312_v24 = vsel %vm46_vm7, 1, %v461_v4  ;;  %vm50_vm13 = vcmp.gt.f32.partialorder %v564_v14, -0.5 }
   0xe   :  { %77 = vrot.lane.b32.xlu1 %v538_v9, %s460_s16  ;;  %75 = vrot.lane.b32.xlu0 %v543_v10, %s460_s16  ;;  %p454_p2 = pnand %p452_p1, %p449_p0 }
  0x12   :  { %317 = vperm.xlu1 %415, %v306_v11   ;;  %314 = vperm.xlu0 %414, %v305_v12  }
  0x16   :  { %225 = vrot.lane.b32.xlu1 %v529_v8, %s460_s16  ;;  %227 = vrot.lane.b32.xlu0 %v524_v7, %s460_s16  ;;  %v26_v8 = vld [vmem:[%s834_s1 + $0x18] sm:$0xff] }
  0x1a   :  { %320 = vperm.xlu1 %415, %v307_v15   ;;  %229 = vrot.lane.b32.xlu0 %v558_v13, %s460_s16 }
  0x1e   :  { %323 = vperm.xlu1 %415, %v308_v17   ;;  %231 = vrot.lane.b32.xlu0 %v564_v14, %s460_s16 }
  0x22   :  { %326 = vperm.xlu1 %415, %v309_v19   ;;  %233 = vrot.lane.b32.xlu0 %v576_v16, %s460_s16 }
  0x26   :  { %329 = vperm.xlu1 %415, %v310_v21   ;;  %235 = vrot.lane.b32.xlu0 %v586_v18, %s460_s16 }
  0x2a   :  { %332 = vperm.xlu1 %415, %v311_v23   ;;  %237 = vrot.lane.b32.xlu0 %v596_v20, %s460_s16 }
  0x2e   :  { %335 = vperm.xlu1 %415, %v312_v24   ;;  %239 = vrot.lane.b32.xlu0 %v606_v22, %s460_s16 }
  0x74   :  { %v68_v25 = vpop.permute.xlu1 %67  ;;  %v64_v26 = vpop.permute.xlu0 %63 }
  0x75   :  { %v89_v27 = vsub.f32 %v486_v0, %v68_v25  ;;  %v87_v28 = vsub.f32 %v491_v1, %v64_v26 }
  0x77   :  { %v97_v29 = vsub.f32 0.0, %v89_v27  ;;  %v95_v30 = vsub.f32 0.0, %v87_v28 }
  0x78   :  { %v70_v31 = vpop.permute.xlu1 %69  ;;  %v66_v32 = vpop.permute.xlu0 %65 }
  0x79   :  { %v623_v33 = vsel %vm41_vm2, %v89_v27, %v97_v29  ;;  %v627_v34 = vsel %vm39_vm1, %v87_v28, %v95_v30  ;;  %v90_v35 = vsub.f32 %v500_v2, %v70_v31  ;;  %v88_v36 = vsub.f32 %v505_v3, %v66_v32 }
  0x7a   :  { %v121_v37 = vand.u32 2147483647, %v623_v33  ;;  %v119_v38 = vand.u32 2147483647, %v627_v34  ;;  %vm52_vm2 = vcmp.gt.f32.partialorder %v586_v18, -0.5 }
  0x7b   :  { %v98_v39 = vsub.f32 0.0, %v90_v35  ;;  %v96_v40 = vsub.f32 0.0, %v88_v36 }
  0x7c   :  { %v129_v41 = vsub.f32 0.0, %v121_v37  ;;  %v127_v42 = vsub.f32 0.0, %v119_v38  ;;  %v74_v43 = vpop.permute.xlu1 %73  ;;  %v72_v44 = vpop.permute.xlu0 %71 }
  0x7d   :  { %v635_v45 = vsel %vm42_vm3, %v90_v35, %v98_v39  ;;  %v639_v46 = vsel %vm40_vm0, %v88_v36, %v96_v40  ;;  %v92_v47 = vsub.f32 %v514_v5, %v74_v43  ;;  %v91_v48 = vsub.f32 %v519_v6, %v72_v44  ;;  %v23_v39 = vld [vmem:[%s834_s1] sm:$0xff]  ;;  %v24_v40 = vld [vmem:[%s834_s1 + $0x8] sm:$0xff] }
  0x7e   :  { %v139_v49 = vmul.f32 1.442695, %v129_v41  ;;  %v135_v50 = vmul.f32 1.442695, %v127_v42  ;;  %v122_v51 = vand.u32 2147483647, %v635_v45 }
  0x7f   :  { %v120_v52 = vand.u32 2147483647, %v639_v46  ;;  %v100_v53 = vsub.f32 0.0, %v92_v47  ;;  %v99_v54 = vsub.f32 0.0, %v91_v48 }
  0x80   :  { %416 = vpow2.f32 %v139_v49  ;;  %v78_v55 = vpop.permute.xlu1 %77  ;;  %v76_v56 = vpop.permute.xlu0 %75  ;;  %v130_v57 = vsub.f32 0.0, %v122_v51  ;;  %v111_v51 = vmax.f32 %v627_v34, 0.0 }
  0x81   :  { %418 = vpow2.f32 %v135_v50  ;;  %v128_v58 = vsub.f32 0.0, %v120_v52  ;;  %v647_v59 = vsel %vm44_vm5, %v92_v47, %v100_v53  ;;  %v652_v61 = vsel %vm43_vm4, %v91_v48, %v99_v54 }
  0x82   :  { %v124_v60 = vand.u32 2147483647, %v647_v59  ;;  %v94_v62 = vsub.f32 %v538_v9, %v78_v55  ;;  %v141_v63 = vmul.f32 1.442695, %v130_v57  ;;  %v93_v1 = vsub.f32 %v543_v10, %v76_v56 }
  0x83   :  { %v137_v0 = vmul.f32 1.442695, %v128_v58  ;;  %v123_v3 = vand.u32 2147483647, %v652_v61  ;;  %v113_v47 = vmax.f32 %v623_v33, 0.0  ;;  %v114_v52 = vmax.f32 %v635_v45, 0.0 }
  0x84   :  { %v132_v2 = vsub.f32 0.0, %v124_v60  ;;  %v102_v4 = vsub.f32 0.0, %v94_v62  ;;  %420 = vpow2.f32 %v141_v63  ;;  %v101_v5 = vsub.f32 0.0, %v93_v1 }
  0x85   :  { %422 = vpow2.f32 %v137_v0  ;;  %v131_v11 = vsub.f32 0.0, %v123_v3  ;;  %v112_v53 = vmax.f32 %v639_v46, 0.0  ;;  %v115_v63 = vmax.f32 %v652_v61, 0.0 }
  0x86   :  { %v145_v6 = vmul.f32 1.442695, %v132_v2  ;;  %v659_v12 = vsel %vm46_vm7, %v94_v62, %v102_v4  ;;  %v664_v9 = vsel %vm45_vm6, %v93_v1, %v101_v5  ;;  %v116_v62 = vmax.f32 %v647_v59, 0.0 }
  0x87   :  { %v126_v15 = vand.u32 2147483647, %v659_v12  ;;  %v143_v10 = vmul.f32 1.442695, %v131_v11  ;;  %v125_v17 = vand.u32 2147483647, %v664_v9 }
  0x88   :  { %424 = vpow2.f32 %v145_v6  ;;  %v118_v2 = vmax.f32 %v659_v12, 0.0  ;;  %vm51_vm4 = vcmp.gt.f32.partialorder %v576_v16, -0.5  ;;  %vm53_vm6 = vcmp.gt.f32.partialorder %v596_v20, -0.5 }
  0x89   :  { %v134_v19 = vsub.f32 0.0, %v126_v15  ;;  %426 = vpow2.f32 %v143_v10  ;;  %v133_v23 = vsub.f32 0.0, %v125_v17  ;;  %v117_v17 = vmax.f32 %v664_v9, 0.0 }
  0x8a   :  { %v417_v21 = vpop.eup %416 }
  0x8b   :  { %v419_v24 = vpop.eup %418  ;;  %v153_v25 = vadd.f32 1.0, %v417_v21  ;;  %v149_v26 = vmul.f32 1.442695, %v134_v19  ;;  %v147_v28 = vmul.f32 1.442695, %v133_v23  ;;  %v25_v23 = vld [vmem:[%s834_s1 + $0x10] sm:$0xff] }
  0x8c   :  { %v151_v27 = vadd.f32 1.0, %v419_v24 }
  0x8d   :  { %428 = vlog2.f32 %v153_v25 }
  0x8e   :  { %430 = vlog2.f32 %v151_v27  ;;  %v421_v29 = vpop.eup %420 }
  0x8f   :  { %432 = vpow2.f32 %v149_v26  ;;  %v423_v30 = vpop.eup %422  ;;  %v154_v31 = vadd.f32 1.0, %v421_v29 }
  0x90   :  { %434 = vpow2.f32 %v147_v28  ;;  %v152_v32 = vadd.f32 1.0, %v423_v30 }
  0x91   :  { %v667_v35 = vpop.permute.xlu1 %317  ;;  %v669_v36 = vpop.permute.xlu0 %314  ;;  %436 = vlog2.f32 %v154_v31 }
  0x92   :  { %v425_v37 = vpop.eup %424  ;;  %438 = vlog2.f32 %v152_v32  ;;  %vm338_vm0 = vcmp.eq.s32.totalorder %v667_v35, 1  ;;  %vm337_vm1 = vcmp.eq.s32.totalorder %v669_v36, 1 }
  0x93   :  { %v156_v38 = vadd.f32 1.0, %v425_v37  ;;  %v427_v41 = vpop.eup %426 }
  0x94   :  { %v155_v42 = vadd.f32 1.0, %v427_v41 }
  0x95   :  { %440 = vlog2.f32 %v156_v38  ;;  %v226_v43 = vpop.permute.xlu1 %225  ;;  %v228_v44 = vpop.permute.xlu0 %227 }
  0x96   :  { %v249_v48 = vsub.f32 %v23_v39, %v226_v43  ;;  %v250_v49 = vsub.f32 %v24_v40, %v228_v44  ;;  %442 = vlog2.f32 %v155_v42 }
  0x97   :  { %v429_v50 = vpop.eup %428 }
  0x98   :  { %v431_v54 = vpop.eup %430  ;;  %v164_v55 = vmul.f32 0.6931472, %v429_v50  ;;  %v257_v56 = vand.u32 2147483647, %v249_v48  ;;  %v273_v57 = vmul.f32 0.5, %v249_v48  ;;  %v274_v58 = vmul.f32 0.5, %v250_v49 }
  0x99   :  { %v433_v33 = vpop.eup %432  ;;  %v160_v60 = vmul.f32 0.6931472, %v431_v54  ;;  %v258_v0 = vand.u32 2147483647, %v250_v49  ;;  %v687_v34 = vpop.permute.xlu1 %320 }
  0x9a   :  { %v230_v45 = vpop.permute.xlu0 %229  ;;  %v435_v1 = vpop.eup %434  ;;  %v177_v46 = vadd.f32 %v164_v55, %v113_v47  ;;  %vm690_vm14 = vcmp.lt.f32.partialorder %v257_v56, 1.0  ;;  %v281_v4 = vmul.f32 %v273_v57, %v249_v48  ;;  %v399_v11 = vadd.f32 -0.5, %v257_v56  ;;  %v27_v55 = vld [vmem:[%s834_s1 + $0x20] sm:$0xff] }
  0x9b   :  { %v175_v5 = vadd.f32 %v160_v60, %v111_v51  ;;  %v157_v6 = vadd.f32 1.0, %v435_v1  ;;  %vm694_vm15 = vcmp.lt.f32.partialorder %v258_v0, 1.0  ;;  %v437_v10 = vpop.eup %436  ;;  %v282_v19 = vmul.f32 %v274_v58, %v250_v49  ;;  %v28_v1 = vld [vmem:[%s834_s1 + $0x28] sm:$0xff] }
  0x9c   :  { %v400_v21 = vadd.f32 -0.5, %v258_v0  ;;  %v439_v24 = vpop.eup %438  ;;  %v166_v25 = vmul.f32 0.6931472, %v437_v10  ;;  %v158_v26 = vadd.f32 1.0, %v433_v33  ;;  %v185_v29 = vsel %vm49_vm9, %v177_v46, 0.0 }
  0x9d   :  { %444 = vlog2.f32 %v157_v6  ;;  %v704_v27 = vpop.permute.xlu1 %323  ;;  %v162_v30 = vmul.f32 0.6931472, %v439_v24  ;;  %v297_v31 = vsel %vm690_vm14, %v281_v4, %v399_v11  ;;  %v183_v38 = vsel %vm47_vm8, %v175_v5, 0.0 }
  0x9e   :  { %v232_v28 = vpop.permute.xlu0 %231  ;;  %v298_v32 = vsel %vm694_vm15, %v282_v19, %v400_v21  ;;  %v345_v36 = vsel %vm337_vm1, %v297_v31, 0.0  ;;  %v251_v40 = vsub.f32 %v25_v23, %v230_v45  ;;  %v178_v41 = vadd.f32 %v166_v25, %v114_v52  ;;  %v29_v23 = vld [vmem:[%s834_s1 + $0x30] sm:$0xff] }
  0x9f   :  { %v441_v37 = vpop.eup %440  ;;  %v346_v39 = vsel %vm338_vm0, %v298_v32, 0.0  ;;  %v176_v42 = vadd.f32 %v162_v30, %v112_v53  ;;  %vm339_vm3 = vcmp.eq.s32.totalorder %v687_v34, 1  ;;  %v354_v44 = vsel %vm353_vm10, %v345_v36, 0.0 }
  0xa0   :  { %v170_v13 = vmul.f32 0.6931472, %v441_v37  ;;  %v443_v43 = vpop.eup %442  ;;  %v355_v47 = vsel %vm353_vm10, %v346_v39, 0.0  ;;  %v259_v48 = vand.u32 2147483647, %v251_v40  ;;  %v275_v49 = vmul.f32 0.5, %v251_v40 }
  0xa1   :  { %v723_v50 = vpop.permute.xlu1 %326  ;;  %v195_v51 = vsel %vm191_vm12, %v185_v29, 0.0  ;;  %v192_v52 = vsel %vm191_vm12, %v183_v38, 0.0  ;;  %v184_v53 = vsel %vm48_vm11, %v176_v42, 0.0  ;;  %v168_v54 = vmul.f32 0.6931472, %v443_v43 }
  0xa2   :  { %v234_v35 = vpop.permute.xlu0 %233  ;;  %v193_v56 = vsel %vm191_vm12, %v184_v53, 0.0  ;;  %vm734_vm5 = vcmp.lt.f32.partialorder %v259_v48, 1.0  ;;  %v283_v58 = vmul.f32 %v275_v49, %v251_v40  ;;  %v401_v33 = vadd.f32 -0.5, %v259_v48 }
  0xa3   :  { %v186_v60 = vsel %vm50_vm13, %v178_v41, 0.0  ;;  %v194_v0 = vadd.f32 %v193_v56, %v192_v52  ;;  %v740_v45 = vadd.f32 %v355_v47, %v354_v44  ;;  %v252_v7 = vsub.f32 %v26_v8, %v232_v28 }
  0xa4   :  { %v180_v46 = vadd.f32 %v170_v13, %v116_v62  ;;  %v299_v3 = vsel %vm734_vm5, %v283_v58, %v401_v33  ;;  %v253_v4 = vsub.f32 %v27_v55, %v234_v35  ;;  %446 = vlog2.f32 %v158_v26  ;;  %v30_v13 = vld [vmem:[%s834_s1 + $0x38] sm:$0xff] }
  0xa5   :  { %v749_v5 = vpop.permute.xlu1 %329  ;;  %v179_v14 = vadd.f32 %v168_v54, %v115_v63  ;;  %vm340_vm7 = vcmp.eq.s32.totalorder %v704_v27, 1  ;;  %v260_v11 = vand.u32 2147483647, %v252_v7  ;;  %v276_v15 = vmul.f32 0.5, %v252_v7 }
  0xa6   :  { %v236_v6 = vpop.permute.xlu0 %235  ;;  %v347_v59 = vsel %vm339_vm3, %v299_v3, 0.0  ;;  %v261_v62 = vand.u32 2147483647, %v253_v4  ;;  %v277_v19 = vmul.f32 0.5, %v253_v4  ;;  %vm341_vm9 = vcmp.eq.s32.totalorder %v723_v50, 1 }
  0xa7   :  { %v445_v10 = vpop.eup %444  ;;  %v254_v21 = vsub.f32 %v28_v1, %v236_v6  ;;  %vm760_vm8 = vcmp.lt.f32.partialorder %v260_v11, 1.0  ;;  %v284_v61 = vmul.f32 %v276_v15, %v252_v7  ;;  %v402_v63 = vadd.f32 -0.5, %v260_v11 }
  0xa8   :  { %v172_v25 = vmul.f32 0.6931472, %v445_v10  ;;  %v285_v26 = vmul.f32 %v277_v19, %v253_v4  ;;  %vm54_vm11 = vcmp.gt.f32.partialorder %v606_v22, -0.5  ;;  %v188_v30 = vsel %vm52_vm2, %v180_v46, 0.0 }
  0xa9   :  { %v262_v28 = vand.u32 2147483647, %v254_v21  ;;  %v333_v34 = vpop.permute.xlu1 %332  ;;  %v300_v31 = vsel %vm760_vm8, %v284_v61, %v402_v63  ;;  %v403_v32 = vadd.f32 -0.5, %v261_v62  ;;  %v278_v37 = vmul.f32 0.5, %v254_v21 }
  0xaa   :  { %v238_v29 = vpop.permute.xlu0 %237  ;;  %v357_v36 = vsel %vm353_vm10, %v347_v59, 0.0  ;;  %vm771_vm13 = vcmp.lt.f32.partialorder %v261_v62, 1.0  ;;  %vm342_vm14 = vcmp.eq.s32.totalorder %v749_v5, 1  ;;  %vm343_vm15 = vcmp.eq.s32.totalorder %v333_v34, 1 }
  0xab   :  { %v255_v38 = vsub.f32 %v29_v23, %v238_v29  ;;  %v404_v40 = vadd.f32 -0.5, %v262_v28  ;;  %v286_v41 = vmul.f32 %v278_v37, %v254_v21  ;;  %v181_v43 = vadd.f32 %v172_v25, %v117_v17 }
  0xac   :  { %v348_v44 = vsel %vm340_vm7, %v300_v31, 0.0  ;;  %vm783_vm0 = vcmp.lt.f32.partialorder %v262_v28, 1.0  ;;  %v187_v49 = vsel %vm51_vm4, %v179_v14, 0.0  ;;  %v196_v8 = vadd.f32 %v195_v51, %v194_v0 }
  0xad   :  { %v263_v42 = vand.u32 2147483647, %v255_v38  ;;  %v279_v18 = vmul.f32 0.5, %v255_v38  ;;  %v301_v35 = vsel %vm771_vm13, %v285_v26, %v403_v32  ;;  %v197_v9 = vsel %vm191_vm12, %v186_v60, 0.0  ;;  %v336_v4 = vpop.permute.xlu1 %335 }
  0xae   :  { %v240_v48 = vpop.permute.xlu0 %239  ;;  %v447_v17 = vpop.eup %446  ;;  %v198_v55 = vadd.f32 %v197_v9, %v196_v8  ;;  %v201_v56 = vsel %vm191_vm12, %v188_v30, 0.0  ;;  %v189_v16 = vsel %vm53_vm6, %v181_v43, 0.0  ;;  %v199_v51 = vsel %vm191_vm12, %v187_v49, 0.0 }
  0xaf   :  { %v287_v52 = vmul.f32 %v279_v18, %v255_v38  ;;  %v405_v53 = vadd.f32 -0.5, %v263_v42  ;;  %vm792_vm1 = vcmp.lt.f32.partialorder %v263_v42, 1.0  ;;  %v256_v54 = vsub.f32 %v30_v13, %v240_v48 }
  0xb0   :  { %v174_v57 = vmul.f32 0.6931472, %v447_v17  ;;  %v302_v58 = vsel %vm783_vm0, %v286_v41, %v404_v40  ;;  %v200_v0 = vadd.f32 %v199_v51, %v198_v55  ;;  %v349_v7 = vsel %vm341_vm9, %v301_v35, 0.0 }
  0xb1   :  { %v264_v33 = vand.u32 2147483647, %v256_v54  ;;  %v280_v60 = vmul.f32 0.5, %v256_v54  ;;  %v303_v46 = vsel %vm792_vm1, %v287_v52, %v405_v53  ;;  %v350_v20 = vsel %vm342_vm14, %v302_v58, 0.0 }
  0xb2   :  { %v182_v1 = vadd.f32 %v174_v57, %v118_v2  ;;  %v358_v3 = vadd.f32 %v357_v36, %v740_v45  ;;  %v202_v11 = vadd.f32 %v201_v56, %v200_v0  ;;  %v203_v15 = vsel %vm191_vm12, %v189_v16, 0.0 }
  0xb3   :  { %v288_v6 = vmul.f32 %v280_v60, %v256_v54  ;;  %v406_v14 = vadd.f32 -0.5, %v264_v33  ;;  %vm272_vm2 = vcmp.lt.f32.partialorder %v264_v33, 1.0  ;;  %v359_v12 = vsel %vm353_vm10, %v348_v44, 0.0 }
  0xb4   :  { %v190_v50 = vsel %vm54_vm11, %v182_v1, 0.0  ;;  %v361_v2 = vsel %vm353_vm10, %v349_v7, 0.0  ;;  %v204_v10 = vadd.f32 %v203_v15, %v202_v11  ;;  %v351_v5 = vsel %vm343_vm15, %v303_v46, 0.0 }
  0xb5   :  { %v304_v59 = vsel %vm272_vm2, %v288_v6, %v406_v14  ;;  %v360_v62 = vadd.f32 %v359_v12, %v358_v3  ;;  %vm344_vm3 = vcmp.eq.s32.totalorder %v336_v4, 1  ;;  %v205_v45 = vsel %vm191_vm12, %v190_v50, 0.0 }
  0xb6   :  { %v363_v19 = vsel %vm353_vm10, %v350_v20, 0.0  ;;  %v206_v21 = vadd.f32 %v205_v45, %v204_v10  ;;  %v352_v23 = vsel %vm344_vm3, %v304_v59, 0.0  ;;  %v365_v24 = vsel %vm353_vm10, %v351_v5, 0.0 }
  0xb7   :  { %v362_v22 = vadd.f32 %v361_v2, %v360_v62  ;;  %v367_v63 = vsel %vm353_vm10, %v352_v23, 0.0 }
  0xb8   :  { %207 = vadd.xlane.f32.xlu1 %v206_v21 }
  0xb9   :  { %v364_v61 = vadd.f32 %v363_v19, %v362_v22 }
  0xbb   :  { %v366_v25 = vadd.f32 %v365_v24, %v364_v61 }
  0xbd   :  { %v368_v26 = vadd.f32 %v367_v63, %v366_v25 }
  0xbf   :  { %369 = vadd.xlane.f32.xlu0 %v368_v26 }
 0x145   :  { %v208_v28 = vpop.xlane.xlu1 %207 }
 0x146   :  { %v209_v34 = vrot.slane %v208_v28, 4 }
 0x148   :  { %v210_v29 = vadd.f32 %v209_v34, %v208_v28 }
 0x14a   :  { %v211_v30 = vrot.slane %v210_v29, 2 }
 0x14c   :  { %v370_v31 = vpop.xlane.xlu0 %369  ;;  %v212_v37 = vadd.f32 %v211_v30, %v210_v29 }
 0x14d   :  { %v371_v32 = vrot.slane %v370_v31, 4 }
 0x14e   :  { %v213_v36 = vrot.slane %v212_v37, 1 }
 0x14f   :  { %v372_v38 = vadd.f32 %v371_v32, %v370_v31 }
 0x150   :  { %v214_v40 = vadd.f32 %v213_v36, %v212_v37 }
 0x151   :  { %v373_v39 = vrot.slane %v372_v38, 2 }
 0x152   :  { %407 = vpush %v214_v40 }
 0x153   :  { %v374_v41 = vadd.f32 %v373_v39, %v372_v38 }
 0x155   :  { %v375_v42 = vrot.slane %v374_v41, 1 }
 0x157   :  { %v376_v18 = vadd.f32 %v375_v42, %v374_v41 }
 0x159   :  { %409 = vpush %v376_v18 }
 0x183   :  { %s408_s1 = spop %407 }
 0x184   :  { %s216_s5 = smul.f32 0.015625, %s408_s1 }
 0x186   :  { %380 = sst [smem:[#allocation2]] %s216_s5 }
 0x18a   :  { %s410_s6 = spop %409 }
 0x18b   :  { %s378_s7 = smul.f32 0.015625, %s410_s6 }
 0x18d   :  { %382 = sst [smem:[#allocation2 + $0x1]] %s378_s7 }
 0x18e   :  { %s383_s0 = sadd.f32 %s378_s7, %s216_s5 }
 0x190   :  { %385 = sst [smem:[#allocation2 + $0x2]] %s383_s0 }
 0x191   :  { %457 = shalt.err (!%p454_p2)
}
 0x192   :  { %s462_s15 = smov [#allocation2]  }
 0x193   :  { %393 = dma.smem_to_hbm %s462_s15, 16, %s836_s3, [#allocation3]  }
 0x194   :  { %458 = dma.done.wait [#allocation3], 16  }
 0x195   :  { %459 = vsyncadd [#allocation3], 4294967280 }
 0x196   :  { %397 = sfence }
 0x197   :  { %398 = vsyncpa [#allocation3], 1 }

</bundles_post_ra>
